<compile_context>
chip_gen: v7x
topology: tpu7x:2x2x1
jax: 0.10.0
libtpu: 0.0.40
codegen_flags: <defaults>
</compile_context>

<pallas_src>
import functools

import jax
import jax.numpy as jnp
import numpy as np
from jax import lax
from jax.experimental import pallas as pl
from jax.experimental.pallas import tpu as pltpu


def _gconv_kernel(p_ref, w_ref, b_ref, o_ref):
    """One (batch, hw-tile) grid step of the fused gated conv.

    p_ref : (K, t_hw)       im2col patches (HW on lanes) for this tile
    w_ref : (2*C_out, K)    [w1; w2] stacked along output channels
    b_ref : (2*C_out, 1)    [b1; b2]
    o_ref : (C_out, t_hw)   conv1 * sigmoid(conv2)
    """
    c_out = o_ref.shape[0]
    # Single MXU matmul covering both convolutions, f32 accumulation.
    d = jnp.dot(w_ref[...], p_ref[...], preferred_element_type=jnp.float32)
    d = d + b_ref[...]                       # lane-broadcast bias add
    d1 = d[:c_out, :]                        # conv1 rows
    d2 = d[c_out:, :]                        # conv2 rows
    o_ref[...] = (d1 * jax.nn.sigmoid(d2)).astype(o_ref.dtype)


def _im2col_nkm(x, kernel_size, stride):
    """x: (N, C, H, W) -> patches (N, C*kh*kw, H_out*W_out), plus (H_out, W_out).

    K ordering is C-major, then kh, then kw (matches the PyTorch weight
    reshape); the last axis is row-major over (H_out, W_out).
    """
    n, c, h, w = x.shape
    kh, kw = kernel_size
    sh, sw = stride
    h_out = (h - kh) // sh + 1
    w_out = (w - kw) // sw + 1
    pieces = []
    for i in range(kh):
        for j in range(kw):
            pieces.append(
                x[:, :, i : i + (h_out - 1) * sh + 1 : sh,
                        j : j + (w_out - 1) * sw + 1 : sw]
            )  # (N, C, H_out, W_out)
    # (kh*kw, N, C, Ho, Wo) -> (N, C, kh*kw, Ho, Wo) -> (N, K, Ho*Wo)
    p = jnp.stack(pieces, axis=0)
    p = jnp.transpose(p, (1, 2, 0, 3, 4))
    p = p.reshape(n, c * kh * kw, h_out * w_out)
    return p, h_out, w_out


def _pick_hw_tile(hw, k, n_batch):
    """Lane-tile size over the flattened H_out*W_out axis for one grid step.

    Target ~1 MiB of streamed patches per step (K * t * 4 B) so the fixed
    ~0.35 us per-grid-step overhead is amortized at HBM bandwidth.  On small
    inputs, split only if it can stay 128-aligned, aiming for >=4 total grid
    steps (keeps both v7x TensorCores busy and lets the DMA pipeline overlap).
    """
    target = max(128, (((1 << 20) // (4 * k)) // 128) * 128)
    if hw > target:
        return target                       # multiple of 128; last block masked
    if n_batch < 4 and hw >= 4 * 128:
        want_hw_steps = -(-4 // n_batch)    # ceil(4 / n_batch)
        return max(128, ((-(-hw // want_hw_steps) + 127) // 128) * 128)
    return hw                               # full-extent block (no alignment req.)


@functools.partial(jax.jit, static_argnames=("kernel_size", "stride"))
def gconv2d(x, w1, b1, w2, b2, *, kernel_size=(2, 3), stride=(1, 2)):
    """Gated conv2d: conv(x; w1,b1) * sigmoid(conv(x; w2,b2)).

    x : (N, C_in, H, W)         float32 (NCHW, matching PyTorch)
    w*: (C_out, C_in, kh, kw)   float32 (PyTorch Conv2d weight layout)
    b*: (C_out,)                float32
    returns (N, C_out, H_out, W_out) float32
    """
    n, c_in, h, w = x.shape
    c_out = w1.shape[0]
    kh, kw = kernel_size

    patches, h_out, w_out = _im2col_nkm(x, kernel_size, stride)   # (N, K, HW)
    _, k, hw = patches.shape

    # Fuse the two convolutions into one matmul operand.
    w_cat = jnp.concatenate(
        [w1.reshape(c_out, k), w2.reshape(c_out, k)], axis=0)     # (2*C_out, K)
    b_cat = jnp.concatenate([b1, b2], axis=0).reshape(2 * c_out, 1)

    t_hw = _pick_hw_tile(hw, k, n)
    hw_steps = pl.cdiv(hw, t_hw)

    # VMEM in flight: double-buffered input/output tiles + weights/bias (f32).
    working_set = 4 * (2 * (k + c_out) * t_hw + 2 * (2 * c_out * (k + 1)))
    vmem_limit = int(min(48 * 2**20, max(16 * 2**20, 4 * working_set)))

    out = pl.pallas_call(
        _gconv_kernel,
        out_shape=jax.ShapeDtypeStruct((n, c_out, hw), jnp.float32),
        grid_spec=pltpu.PrefetchScalarGridSpec(
            num_scalar_prefetch=0,
            grid=(n, hw_steps),
            in_specs=[
                # Squeezed batch dim: kernel sees (K, t_hw) / (C_out, t_hw).
                pl.BlockSpec((None, k, t_hw), lambda b, i: (b, 0, i)),   # patches
                pl.BlockSpec((2 * c_out, k), lambda b, i: (0, 0)),       # [w1; w2]
                pl.BlockSpec((2 * c_out, 1), lambda b, i: (0, 0)),       # [b1; b2]
            ],
            out_specs=pl.BlockSpec((None, c_out, t_hw), lambda b, i: (b, 0, i)),
        ),
        compiler_params=pltpu.CompilerParams(
            dimension_semantics=("parallel", "parallel"),
            # Let XLA fuse the im2col producer into the Pallas input DMA so the
            # kh*kw-inflated patch matrix avoids an HBM round-trip when possible.
            allow_input_fusion=[True, False, False],
            vmem_limit_bytes=vmem_limit,
        ),
    )(patches, w_cat, b_cat)

    # (N, C_out, HW) -> (N, C_out, H_out, W_out): free reshape, no transpose.
    return out.reshape(n, c_out, h_out, w_out)


def _reference(x, w1, b1, w2, b2, stride):
    dn = ("NCHW", "OIHW", "NCHW")
    d1 = lax.conv_general_dilated(x, w1, stride, "VALID", dimension_numbers=dn)
    d1 = d1 + b1[None, :, None, None]
    d2 = lax.conv_general_dilated(x, w2, stride, "VALID", dimension_numbers=dn)
    d2 = d2 + b2[None, :, None, None]
    return d1 * jax.nn.sigmoid(d2)


if __name__ == "__main__":
    # Small shapes consistent with the module: N=2, C_in=4, H=W=16, C_out=8.
    N, C_IN, H, W = 2, 4, 16, 16
    C_OUT = 8
    KH, KW = 2, 3
    STRIDE = (1, 2)

    key = jax.random.PRNGKey(0)
    kx, kw1, kb1, kw2, kb2 = jax.random.split(key, 5)

    x = jax.random.normal(kx, (N, C_IN, H, W), dtype=jnp.float32)
    # Deterministic init mimicking PyTorch Conv2d uniform(-1/sqrt(fan_in), +)
    fan_in = C_IN * KH * KW
    bound = 1.0 / np.sqrt(fan_in)
    w1 = jax.random.uniform(kw1, (C_OUT, C_IN, KH, KW), jnp.float32, -bound, bound)
    b1 = jax.random.uniform(kb1, (C_OUT,), jnp.float32, -bound, bound)
    w2 = jax.random.uniform(kw2, (C_OUT, C_IN, KH, KW), jnp.float32, -bound, bound)
    b2 = jax.random.uniform(kb2, (C_OUT,), jnp.float32, -bound, bound)

    out = gconv2d(x, w1, b1, w2, b2, kernel_size=(KH, KW), stride=STRIDE)
    out = jax.block_until_ready(out)

    ref = _reference(x, w1, b1, w2, b2, STRIDE)
    ref = jax.block_until_ready(ref)

    assert out.shape == (N, C_OUT, H - KH + 1, (W - KW) // STRIDE[1] + 1), out.shape
    np.testing.assert_allclose(np.asarray(out), np.asarray(ref), rtol=1e-5, atol=1e-5)

    print("KERNEL_OK")
</pallas_src>

<mosaic_0001>
module attributes {stable_mosaic.version = 11 : i64} {
  func.func @_gconv_kernel(%arg0: i32, %arg1: i32, %arg2: memref<1x24x105xf32, #tpu.memory_space<vmem>>, %arg3: memref<16x24xf32, #tpu.memory_space<vmem>>, %arg4: memref<16x1xf32, #tpu.memory_space<vmem>>, %arg5: memref<1x8x105xf32, #tpu.memory_space<vmem>>) attributes {dimension_semantics = [#tpu.dimension_semantics<parallel>, #tpu.dimension_semantics<parallel>], iteration_bounds = array<i64: 2, 1>, scalar_prefetch = 0 : i64, scratch_operands = 0 : i64, tpu.core_type = #tpu.core_type<tc>, window_params = [{transform_indices = @transform_0, window_bounds = array<i64: 1, 24, 105>}, {pipeline_mode = #tpu.pipeline_mode<synchronous>, transform_indices = @transform_1, window_bounds = array<i64: 16, 24>}, {pipeline_mode = #tpu.pipeline_mode<synchronous>, transform_indices = @transform_2, window_bounds = array<i64: 16, 1>}, {transform_indices = @transform_3, window_bounds = array<i64: 1, 8, 105>}]} {
    %c0 = arith.constant 0 : index
    %c0_0 = arith.constant 0 : index
    %0 = vector.load %arg3[%c0, %c0_0] : memref<16x24xf32, #tpu.memory_space<vmem>>, vector<16x24xf32>
    %c0_1 = arith.constant 0 : index
    %c0_2 = arith.constant 0 : index
    %c0_3 = arith.constant 0 : index
    %1 = vector.load %arg2[%c0_1, %c0_2, %c0_3] : memref<1x24x105xf32, #tpu.memory_space<vmem>>, vector<1x24x105xf32>
    %2 = vector.shape_cast %1 : vector<1x24x105xf32> to vector<24x105xf32>
    %cst = arith.constant dense<0.000000e+00> : vector<16x105xf32>
    %3 = tpu.matmul %0, %2, %cst {dimension_numbers = #tpu.dot_dimension_numbers<[1], [0], [0], [1], [0, 0, 1, 1], [], []>} : vector<16x24xf32>, vector<24x105xf32>, vector<16x105xf32> -> vector<16x105xf32>
    %c0_4 = arith.constant 0 : index
    %c0_5 = arith.constant 0 : index
    %4 = vector.load %arg4[%c0_4, %c0_5] : memref<16x1xf32, #tpu.memory_space<vmem>>, vector<16x1xf32>
    %5 = vector.broadcast %4 : vector<16x1xf32> to vector<16x105xf32>
    %6 = arith.addf %3, %5 : vector<16x105xf32>
    %7 = vector.extract_strided_slice %6 {offsets = [0, 0], sizes = [8, 105], strides = [1, 1]} : vector<16x105xf32> to vector<8x105xf32>
    %8 = vector.extract_strided_slice %6 {offsets = [8, 0], sizes = [8, 105], strides = [1, 1]} : vector<16x105xf32> to vector<8x105xf32>
    %9 = arith.negf %8 : vector<8x105xf32>
    %10 = math.exp %9 : vector<8x105xf32>
    %cst_6 = arith.constant 1.000000e+00 : f32
    %11 = vector.broadcast %cst_6 : f32 to vector<8x105xf32>
    %12 = arith.addf %11, %10 : vector<8x105xf32>
    %13 = arith.divf %11, %12 : vector<8x105xf32>
    %14 = arith.mulf %7, %13 : vector<8x105xf32>
    %c0_7 = arith.constant 0 : index
    %c0_8 = arith.constant 0 : index
    %c0_9 = arith.constant 0 : index
    %15 = vector.load %arg5[%c0_7, %c0_8, %c0_9] : memref<1x8x105xf32, #tpu.memory_space<vmem>>, vector<1x8x105xf32>
    %16 = vector.shape_cast %15 : vector<1x8x105xf32> to vector<8x105xf32>
    %17 = vector.shape_cast %14 : vector<8x105xf32> to vector<1x8x105xf32>
    tpu.vector_store %arg5[%c0_7, %c0_8, %c0_9], %17 {strides = array<i32>} : memref<1x8x105xf32, #tpu.memory_space<vmem>>, vector<1x8x105xf32>,
    return
  }
  func.func @transform_0(%arg0: i32, %arg1: i32) -> (i32, i32, i32) {
    %c0_i32 = arith.constant 0 : i32
    %c0_i32_0 = arith.constant 0 : i32
    return %arg0, %c0_i32, %arg1 : i32, i32, i32
  }
  func.func @transform_1(%arg0: i32, %arg1: i32) -> (i32, i32) {
    %c0_i32 = arith.constant 0 : i32
    %c0_i32_0 = arith.constant 0 : i32
    %c0_i32_1 = arith.constant 0 : i32
    return %c0_i32, %c0_i32_0 : i32, i32
  }
  func.func @transform_2(%arg0: i32, %arg1: i32) -> (i32, i32) {
    %c0_i32 = arith.constant 0 : i32
    %c0_i32_0 = arith.constant 0 : i32
    %c0_i32_1 = arith.constant 0 : i32
    return %c0_i32, %c0_i32_0 : i32, i32
  }
  func.func @transform_3(%arg0: i32, %arg1: i32) -> (i32, i32, i32) {
    %c0_i32 = arith.constant 0 : i32
    %c0_i32_0 = arith.constant 0 : i32
    return %arg0, %c0_i32, %arg1 : i32, i32, i32
  }
}

</mosaic_0001>

<bundles_post_ra>
// kernel: gconv2d.1
= control target key start
LH: loop header
LB: loop body
LE: loop exit
PB: predicated region body
PF: predicated region fallthrough
CT: control target
= control target key end

     0   :  { %s491_s12 = smov 0   ;;  %s493_s13 = smov 0   ;;  %s542_s0 = inlined_call_operand.vmem [shape: f32[2,24,105], index: 0, kind: input, shape index: {}]   ;;  %s543_s1 = inlined_call_operand.vmem [shape: f32[16,24], index: 1, kind: input, shape index: {}]   ;;  %s544_s2 = inlined_call_operand.vmem [shape: f32[16,1], index: 2, kind: input, shape index: {}]   ;;  %s545_s3 = inlined_call_operand.vmem [shape: f32[2,8,105], index: 3, kind: output, shape index: {}]  }
   0x1   :  { %s495_s14 = smov 0  }
   0x2 LB: > { %s25_s15 = sadd.s32 1, %s464_s13  ;;  %p389_p0 = scmp.ge.s32.totalorder %s468_s14, 1  ;;  %s468_s14 = sphi %s495_s14, %s13_s14   ;;  %s464_s13 = sphi %s493_s13, %s547_s13   ;;  %s460_s12 = sphi %s491_s12, %s546_s12  }
   0x3   : > { %p27_p1 = scmp.ge.s32.totalorder %s25_s15, 2  ;;  %p156_p2 = scmp.lt.s32.totalorder %s468_s14, 3 }
   0x5   : > { %s549_s15 = smov (%p27_p1, %s25_s15), 0  ;;  %p157_p3 = pnand %p389_p0, %p156_p2 }
   0x6   : > { %p185_p4 = scmp.lt.s32.totalorder (!%p157_p3), %s460_s12, 1  ;;  %v200_v0 = vld [vmem:[%s543_s1] sm:$0xff] (!%p157_p3)  ;;  %vm217_vm0 = vcmask (!%p157_p3), 195584   ;;  %v206_v1 = vld [vmem:[%s544_s2 + $0x8] sm:$0xff] (!%p157_p3)  ;;  %v470_v2 = vmov (!%p157_p3), 0   ;;  %vm306_vm1 = vcmask (!%p157_p3), 859136  }
   0x7   : > { %160 = sbr.rel (%p157_p3) target bundleno = 270 (0x10e), region = 32  ;;  %408 = vmatprep.mubr.msk.f32.mxu0 (!%p157_p3), %vm217_vm0, %v200_v0  ;;  %441 = vset.pattern.permute.xlu0 (!%p157_p3), %v470_v2  ;;  %v205_v3 = vld [vmem:[%s544_s2] sm:$0xff] (!%p157_p3)  ;;  %v201_v8 = vld [vmem:[%s543_s1 + $0x8] sm:$0xff] (!%p157_p3) }
   0x8   : > { %214 = vperm.xlu0 (!%p157_p3), %441, %v206_v1  }
   0xc   : > { %209 = vperm.xlu0 (!%p157_p3), %441, %v205_v3  }
   0xe   : > { %s551_s12 = smov (!%p185_p4, %s460_s12), 1 }
   0xf   : > { %s415_s22 = smul.u32 24, %s551_s12  ;;  %s391_s28 = sshll.u32 %s551_s12, 3 }
  0x10   : > { %s199_s4 = scalar_lea.vmem %s545_s3, %s391_s28 }
  0x11   : > { %s192_s25 = scalar_lea.vmem %s542_s0, %s415_s22 }
  0x12   : > { %v202_v4 = vld [vmem:[%s192_s25] sm:$0xff]  ;;  %v203_v5 = vld [vmem:[%s192_s25 + $0x8] sm:$0xff]  ;;  %v204_v7 = vld [vmem:[%s192_s25 + $0x10] sm:$0xff] }
  0x13   : > { %v411_v6 = vpack.c.bf16 %v203_v5, %v202_v4 }
  0x15   : > { %412 = vmatprep.subr.bf16.mxu0 %v411_v6 }
  0x16   : > { %414 = vmatpush3.bf16.msra.mxu0 %v411_v6 }
  0x17   : > { %406 = vmatprep.subr.mxu0 %v204_v7 }
  0x1a   : > { %407 = vmatpush3.msra.mxu0 %v204_v7 }
  0x1b   : > { %409 = vmatmul.mubr.msk.f32.vlgmr.msra.gmra.mrb[0].mxu0 %vm217_vm0, %v201_v8 }
  0x87   : > { %v215_v9 = vpop.permute.xlu0 %214 }
  0x8b   : > { %v210_v16 = vpop.permute.xlu0 %209 }
  0xee   : > { %v410_v10 = vpop.f32.mrb[0].mxu0 }
  0xef   : > { %v296_v11 = vadd.f32 %v410_v10, %v215_v9  ;;  %v290_v12 = vpop.f32.mrb[1].mxu0 }
  0xf0   : > { %v291_v17 = vadd.f32 %v290_v12, %v210_v16 }
  0xf1   : > { %v394_v13 = vmul.f32 -1.442695, %v296_v11 }
  0xf3   : > { %442 = vpow2.f32 %v394_v13 }
  0xfd   : > { %v443_v14 = vpop.eup %442 }
  0xfe   : > { %v302_v15 = vadd.f32 1.0, %v443_v14 }
 0x100   : > { %444 = vrcp.f32 %v302_v15 }
 0x10a   : > { %v445_v18 = vpop.eup %444 }
 0x10b   : > { %v305_v19 = vmul.f32 %v445_v18, %v291_v17 }
 0x10d   : > { %307 = vst.msk [vmem:[%s199_s4] sm:$0xff] %vm306_vm1, %v305_v19 }
 0x10e PF: > { %s13_s14 = sadd.s32 1, %s468_s14   ;;  %s546_s12 = smov %s464_s13 }
 0x10f   : > { %p10_p5 = scmp.ge.s32.totalorder %s13_s14, 4   ;;  %s547_s13 = smov %s549_s15 }
 0x111   :  { %12 = sbr.rel (!%p10_p5) target bundleno = 2 (0x2), region = 62 }

</bundles_post_ra>
